<compile_context>
chip_gen: v7x
topology: tpu7x:2x2x1
jax: 0.10.0
libtpu: 0.0.40
codegen_flags: <defaults>
</compile_context>

<pallas_src>
import jax
import jax.numpy as jnp
from jax import lax
from jax.experimental import pallas as pl
from jax.experimental.pallas import tpu as pltpu

BN_EPS = 1e-5
LANE = 128                              # pad K and OC to multiples of this
MAX_TILE_M = 512                        # M tile cap; 256-aligned for v6e/v7x MXU
VMEM_LIMIT_BYTES = 32 * 1024 * 1024     # > v5e 16 MiB default, safe on v7x 64 MiB physical


def _round_up(x, m):
    return (x + m - 1) // m * m


def _stats_kernel(p_ref, w_ref, psum_ref, psumsq_ref):
    # p_ref:      (TILE_M, K_pad)  bf16 im2col patches tile
    # w_ref:      (K_pad, OC_pad)  bf16 reshaped conv weight (VMEM-resident across tiles)
    # psum_ref:   (8, OC_pad)      f32 per-tile partial sum   (sublane-broadcast)
    # psumsq_ref: (8, OC_pad)      f32 per-tile partial sum of squares
    z = jnp.dot(p_ref[...], w_ref[...], preferred_element_type=jnp.float32)
    s = jnp.sum(z, axis=0, keepdims=True)            # (1, OC_pad)
    ss = jnp.sum(z * z, axis=0, keepdims=True)       # (1, OC_pad)
    psum_ref[...] = jnp.broadcast_to(s, psum_ref.shape)
    psumsq_ref[...] = jnp.broadcast_to(ss, psumsq_ref.shape)


def _matmul_bn_relu_kernel(p_ref, w_ref, scale_ref, shift_ref, o_ref):
    # Recompute z on the MXU, then y = relu(z*scale + shift).
    # scale/shift are (1, OC_pad) and broadcast over the rows of the tile.
    z = jnp.dot(p_ref[...], w_ref[...], preferred_element_type=jnp.float32)
    o_ref[...] = jnp.maximum(z * scale_ref[...] + shift_ref[...], 0.0)


def _im2col(x, kh, kw, stride):
    # x: (N, C, H, W) -> (N*OH*OW, C*kh*kw)
    n, c, h, w = x.shape
    oh = (h - kh) // stride + 1
    ow = (w - kw) // stride + 1
    patches = []
    for i in range(kh):
        for j in range(kw):
            patches.append(x[:, :, i:i + oh * stride:stride, j:j + ow * stride:stride])
    p = jnp.stack(patches, axis=2)                      # (N, C, kh*kw, OH, OW)
    p = p.reshape(n, c * kh * kw, oh, ow)               # index = c*(kh*kw) + i*kw + j
    p = p.transpose(0, 2, 3, 1).reshape(n * oh * ow, c * kh * kw)
    return p, oh, ow


def conv_block_forward(x, conv_w, conv_b, bn_gamma, bn_beta, *, stride=1, padding=0):
    """x: (N, C, H, W).  Returns (N, OC, OH, OW), matching PyTorch ConvBlock."""
    n, c, h, w = x.shape
    oc, _, kh, kw = conv_w.shape
    if padding > 0:
        x = jnp.pad(x, ((0, 0), (0, 0), (padding, padding), (padding, padding)))

    patches, oh, ow = _im2col(x, kh, kw, stride)        # (M, K) f32
    m, k = patches.shape
    del conv_b  # exactly cancelled by the training-mode BN mean subtraction

    k_pad = _round_up(k, LANE)
    oc_pad = _round_up(oc, LANE)
    tile_m = min(MAX_TILE_M, _round_up(m, 256))         # 256-aligned, clamp for tiny M
    m_pad = _round_up(m, tile_m)
    num_tiles = m_pad // tile_m

    # Zero-pad and cast MXU operands to bf16 (accumulation stays f32 in-kernel).
    # Zero-padded rows/cols contribute nothing to the BN sums, so stats stay exact
    # as long as we divide by the true M below.
    patches_p = jnp.zeros((m_pad, k_pad), jnp.bfloat16).at[:m, :k].set(
        patches.astype(jnp.bfloat16))
    w_mat = conv_w.reshape(oc, c * kh * kw).T            # (K, OC)
    w_p = jnp.zeros((k_pad, oc_pad), jnp.bfloat16).at[:k, :oc].set(
        w_mat.astype(jnp.bfloat16))

    # ---- pass 1: tiled matmul -> per-tile partial BN statistics only ----
    # (z is NOT materialized in HBM; it is recomputed in pass 2.)
    psum, psumsq = pl.pallas_call(
        _stats_kernel,
        out_shape=(
            jax.ShapeDtypeStruct((num_tiles * 8, oc_pad), jnp.float32),
            jax.ShapeDtypeStruct((num_tiles * 8, oc_pad), jnp.float32),
        ),
        grid=(num_tiles,),
        in_specs=[
            pl.BlockSpec((tile_m, k_pad), lambda i: (i, 0)),
            pl.BlockSpec((k_pad, oc_pad), lambda i: (0, 0)),   # weight resident
        ],
        out_specs=(
            pl.BlockSpec((8, oc_pad), lambda i: (i, 0)),
            pl.BlockSpec((8, oc_pad), lambda i: (i, 0)),
        ),
        compiler_params=pltpu.CompilerParams(
            dimension_semantics=("parallel",),
            vmem_limit_bytes=VMEM_LIMIT_BYTES),
    )(patches_p, w_p)

    # ---- tiny glue: fold partial stats, build per-channel scale / shift ----
    total = psum.reshape(num_tiles, 8, oc_pad)[:, 0, :].sum(axis=0)        # (OC_pad,)
    total_sq = psumsq.reshape(num_tiles, 8, oc_pad)[:, 0, :].sum(axis=0)   # (OC_pad,)
    mean = total / m
    var = jnp.maximum(total_sq / m - mean * mean, 0.0)   # biased var; clamp fp noise
    inv_std = lax.rsqrt(var + BN_EPS)
    gamma_p = jnp.zeros((oc_pad,), jnp.float32).at[:oc].set(bn_gamma.astype(jnp.float32))
    beta_p = jnp.zeros((oc_pad,), jnp.float32).at[:oc].set(bn_beta.astype(jnp.float32))
    scale = (gamma_p * inv_std).reshape(1, oc_pad)
    shift = (beta_p - mean * gamma_p * inv_std).reshape(1, oc_pad)

    # ---- pass 2: recompute matmul, normalize + ReLU (lane-dense output) ----
    y = pl.pallas_call(
        _matmul_bn_relu_kernel,
        out_shape=jax.ShapeDtypeStruct((m_pad, oc_pad), jnp.float32),
        grid=(num_tiles,),
        in_specs=[
            pl.BlockSpec((tile_m, k_pad), lambda i: (i, 0)),
            pl.BlockSpec((k_pad, oc_pad), lambda i: (0, 0)),   # weight resident
            pl.BlockSpec((1, oc_pad), lambda i: (0, 0)),
            pl.BlockSpec((1, oc_pad), lambda i: (0, 0)),
        ],
        out_specs=pl.BlockSpec((tile_m, oc_pad), lambda i: (i, 0)),
        compiler_params=pltpu.CompilerParams(
            dimension_semantics=("parallel",),
            vmem_limit_bytes=VMEM_LIMIT_BYTES),
    )(patches_p, w_p, scale, shift)

    # Dropout(0.2): identity (see TODO at top).
    # Slice off padding; transpose back to NCHW only to match the PyTorch module's
    # output contract (kernel-side layout is already lane-dense NHWC-flat).
    out = y[:m, :oc].reshape(n, oh, ow, oc).transpose(0, 3, 1, 2)
    return out


if __name__ == "__main__":
    # Small shapes consistent with the module: batch=2, in_ch=4, out_ch=8, 16x16.
    N, C_IN, C_OUT, H, W, KSIZE = 2, 4, 8, 16, 16, 3

    key = jax.random.PRNGKey(0)
    k_x, k_w, k_b, k_g, k_bt = jax.random.split(key, 5)

    x = jax.random.normal(k_x, (N, C_IN, H, W), dtype=jnp.float32)
    # Conv2d params (PyTorch shape conventions), deterministic init.
    conv_w = jax.random.normal(k_w, (C_OUT, C_IN, KSIZE, KSIZE), dtype=jnp.float32) * 0.1
    conv_b = jax.random.normal(k_b, (C_OUT,), dtype=jnp.float32) * 0.1
    # BatchNorm2d affine params.
    bn_gamma = 1.0 + 0.1 * jax.random.normal(k_g, (C_OUT,), dtype=jnp.float32)
    bn_beta = 0.1 * jax.random.normal(k_bt, (C_OUT,), dtype=jnp.float32)

    out = conv_block_forward(x, conv_w, conv_b, bn_gamma, bn_beta,
                             stride=1, padding=0)
    out = jax.block_until_ready(out)

    assert out.shape == (N, C_OUT, H - KSIZE + 1, W - KSIZE + 1), out.shape
    assert bool(jnp.all(out >= 0.0))  # ReLU post-condition
    print("KERNEL_OK")
</pallas_src>

<mosaic_0001>
module attributes {stable_mosaic.version = 11 : i64} {
  func.func @_stats_kernel(%arg0: i32, %arg1: memref<512x128xbf16, #tpu.memory_space<vmem>>, %arg2: memref<128x128xbf16, #tpu.memory_space<vmem>>, %arg3: memref<8x128xf32, #tpu.memory_space<vmem>>, %arg4: memref<8x128xf32, #tpu.memory_space<vmem>>) attributes {dimension_semantics = [#tpu.dimension_semantics<parallel>], iteration_bounds = array<i64: 1>, scalar_prefetch = 0 : i64, scratch_operands = 0 : i64, tpu.core_type = #tpu.core_type<tc>, window_params = [{transform_indices = @transform_0, window_bounds = array<i64: 512, 128>}, {pipeline_mode = #tpu.pipeline_mode<synchronous>, transform_indices = @transform_1, window_bounds = array<i64: 128, 128>}, {transform_indices = @transform_2, window_bounds = array<i64: 8, 128>}, {transform_indices = @transform_3, window_bounds = array<i64: 8, 128>}]} {
    %c0 = arith.constant 0 : index
    %c0_0 = arith.constant 0 : index
    %0 = vector.load %arg1[%c0, %c0_0] : memref<512x128xbf16, #tpu.memory_space<vmem>>, vector<512x128xbf16>
    %c0_1 = arith.constant 0 : index
    %c0_2 = arith.constant 0 : index
    %1 = vector.load %arg2[%c0_1, %c0_2] : memref<128x128xbf16, #tpu.memory_space<vmem>>, vector<128x128xbf16>
    %cst = arith.constant dense<0.000000e+00> : vector<512x128xf32>
    %2 = tpu.matmul %0, %1, %cst {dimension_numbers = #tpu.dot_dimension_numbers<[1], [0], [0], [1], [0, 0, 1, 1], [], []>} : vector<512x128xbf16>, vector<128x128xbf16>, vector<512x128xf32> -> vector<512x128xf32>
    %cst_3 = arith.constant dense<0.000000e+00> : vector<128xf32>
    %3 = vector.multi_reduction <add>, %2, %cst_3 [0] : vector<512x128xf32> to vector<128xf32>
    %4 = vector.shape_cast %3 : vector<128xf32> to vector<1x128xf32>
    %5 = arith.mulf %2, %2 : vector<512x128xf32>
    %cst_4 = arith.constant dense<0.000000e+00> : vector<128xf32>
    %6 = vector.multi_reduction <add>, %5, %cst_4 [0] : vector<512x128xf32> to vector<128xf32>
    %7 = vector.shape_cast %6 : vector<128xf32> to vector<1x128xf32>
    %8 = vector.shape_cast %4 : vector<1x128xf32> to vector<1x128xf32>
    %9 = vector.broadcast %8 : vector<1x128xf32> to vector<8x128xf32>
    %c0_5 = arith.constant 0 : index
    %c0_6 = arith.constant 0 : index
    %10 = vector.load %arg3[%c0_5, %c0_6] : memref<8x128xf32, #tpu.memory_space<vmem>>, vector<8x128xf32>
    tpu.vector_store %arg3[%c0_5, %c0_6], %9 {strides = array<i32>} : memref<8x128xf32, #tpu.memory_space<vmem>>, vector<8x128xf32>,
    %11 = vector.shape_cast %7 : vector<1x128xf32> to vector<1x128xf32>
    %12 = vector.broadcast %11 : vector<1x128xf32> to vector<8x128xf32>
    %c0_7 = arith.constant 0 : index
    %c0_8 = arith.constant 0 : index
    %13 = vector.load %arg4[%c0_7, %c0_8] : memref<8x128xf32, #tpu.memory_space<vmem>>, vector<8x128xf32>
    tpu.vector_store %arg4[%c0_7, %c0_8], %12 {strides = array<i32>} : memref<8x128xf32, #tpu.memory_space<vmem>>, vector<8x128xf32>,
    return
  }
  func.func @transform_0(%arg0: i32) -> (i32, i32) {
    %c0_i32 = arith.constant 0 : i32
    %c0_i32_0 = arith.constant 0 : i32
    return %arg0, %c0_i32 : i32, i32
  }
  func.func @transform_1(%arg0: i32) -> (i32, i32) {
    %c0_i32 = arith.constant 0 : i32
    %c0_i32_0 = arith.constant 0 : i32
    %c0_i32_1 = arith.constant 0 : i32
    return %c0_i32, %c0_i32_0 : i32, i32
  }
  func.func @transform_2(%arg0: i32) -> (i32, i32) {
    %c0_i32 = arith.constant 0 : i32
    %c0_i32_0 = arith.constant 0 : i32
    return %arg0, %c0_i32 : i32, i32
  }
  func.func @transform_3(%arg0: i32) -> (i32, i32) {
    %c0_i32 = arith.constant 0 : i32
    %c0_i32_0 = arith.constant 0 : i32
    return %arg0, %c0_i32 : i32, i32
  }
}

</mosaic_0001>

<bundles_post_ra>
// kernel: tpu_custom_call.1
= control target key start
LH: loop header
LB: loop body
LE: loop exit
PB: predicated region body
PF: predicated region fallthrough
CT: control target
= control target key end

     0   :  { %9 = vsyncpa [#allocation3], 0  ;;  %s1439_s0 = inlined_call_operand.hbm [shape: bf16[512,128], index: 0, kind: input, shape index: {}]   ;;  %s1440_s1 = inlined_call_operand.hbm [shape: bf16[128,128], index: 1, kind: input, shape index: {}]   ;;  %s1441_s2 = inlined_call_operand.hbm [shape: f32[8,128], index: 2, kind: output, shape index: {0}]   ;;  %s1442_s3 = inlined_call_operand.hbm [shape: f32[8,128], index: 3, kind: output, shape index: {1}]  }
   0x1   :  { %10 = vsyncpa [#allocation6], 0 }
   0x2   :  { %11 = vsyncpa [#allocation4], 0 }
   0x3   :  { %12 = vsyncpa [#allocation9], 0  ;;  %s1205_s12 = smov [#allocation2]   ;;  %s1109_s16 = scalar_lea.hbm %s1439_s0, 4096 }
   0x4   :  { %s18_s13 = sshll.u32 %s1205_s12, 4  ;;  %p1110_p0 = scmp.ne.s32.totalorder %s1439_s0, %s1109_s16  ;;  %s19_s13 = int_to_ptr.vmem [resolvable:$true] %s18_s13 }
   0x5   :  { %p1113_p1 = scmp.lt.u32.totalorder %s1109_s16, %s1439_s0 }
   0x7   :  { %p1115_p2 = pnand %p1113_p1, %p1110_p0 }
   0x9   :  { %1118 = shalt.err (!%p1115_p2)
}
   0xa   :  { %s1119_s21 = scalar_lea.vmem %s19_s13, 4096  ;;  %p1124_p4 = scmp.lt.s32.totalorder %s19_s13, %s19_s13 }
   0xb   :  { %p1120_p3 = scmp.ne.s32.totalorder %s19_s13, %s1119_s21  ;;  %p1125_p5 = scmp.lt.s32.totalorder %s1119_s21, %s1119_s21 }
   0xd   :  { %p1126_p6 = por %p1125_p5, %p1124_p4 }
   0xf   :  { %p1127_p7 = pnand %p1126_p6, %p1120_p3 }
  0x11   :  { %1130 = shalt.err (!%p1127_p7)
}
  0x12   :  { %s1206_s22 = smov 64   ;;  %s1207_s23 = smov 4  }
  0x13   :  { %24 = dma.hbm_to_vmem [thread:$0]  %s1439_s0, 4096, %s19_s13, [#allocation3], %s1206_s22, %s1206_s22, %s1207_s23  }
  0x14   :  { %s1208_s26 = smov [#allocation5]   ;;  %s1131_s30 = scalar_lea.hbm %s1440_s1, 1024 }
  0x15   :  { %s30_s27 = sshll.u32 %s1208_s26, 4  ;;  %p1132_p8 = scmp.ne.s32.totalorder %s1440_s1, %s1131_s30  ;;  %s31_s27 = int_to_ptr.vmem [resolvable:$true] %s30_s27 }
  0x16   :  { %p1135_p9 = scmp.lt.u32.totalorder %s1131_s30, %s1440_s1 }
  0x18   :  { %p1137_p10 = pnand %p1135_p9, %p1132_p8 }
  0x1a   :  { %1140 = shalt.err (!%p1137_p10)
}
  0x1b   :  { %s1141_s8 = scalar_lea.vmem %s31_s27, 1024  ;;  %p1146_p12 = scmp.lt.s32.totalorder %s31_s27, %s31_s27 }
  0x1c   :  { %p1142_p11 = scmp.ne.s32.totalorder %s31_s27, %s1141_s8  ;;  %p1147_p13 = scmp.lt.s32.totalorder %s1141_s8, %s1141_s8 }
  0x1e   :  { %p1148_p0 = por %p1147_p13, %p1146_p12 }
  0x20   :  { %p1149_p1 = pnand %p1148_p0, %p1142_p11 }
  0x22   :  { %1152 = shalt.err (!%p1149_p1)
}
  0x23   :  { %36 = dma.hbm_to_vmem [thread:$0]  %s1440_s1, 1024, %s31_s27, [#allocation6], %s1206_s22, %s1206_s22, %s1207_s23  }
  0x24   :  { %1197 = dma.done.wait [#allocation3], 4096  }
  0x25   :  { %1198 = vsyncadd [#allocation3], 4294963200 }
  0x26   :  { %1199 = dma.done.wait [#allocation6], 1024  }
  0x27   :  { %1200 = vsyncadd [#allocation6], 4294966272  ;;  %v1069_v0 = vld [vmem:[#allocation5] sm:$0xff]   ;;  %v1070_v1 = vld [vmem:[#allocation5 + $0x8] sm:$0xff]   ;;  %s1209_s1 = smov [#allocation7]   ;;  %s1210_s11 = smov [#allocation8]  }
  0x28   :  { %967 = vmatprep.subr.bf16.mxu0 %v1069_v0  ;;  %1047 = vmatprep.subr.bf16.mxu1 %v1069_v0  ;;  %v1071_v2 = vld [vmem:[#allocation5 + $0x10] sm:$0xff]   ;;  %v1072_v3 = vld [vmem:[#allocation5 + $0x18] sm:$0xff]   ;;  %v1077_v4 = vld [vmem:[#allocation2] sm:$0xff]   ;;  %s863_s10 = sshll.u32 %s1209_s1, 4  ;;  %s873_s12 = sshll.u32 %s1210_s11, 4  ;;  %s864_s10 = int_to_ptr.vmem [resolvable:$true] %s863_s10  ;;  %s874_s12 = int_to_ptr.vmem [resolvable:$true] %s873_s12 }
  0x29   :  { %968 = vmatpush3.bf16.msra.mxu0 %v1069_v0  ;;  %1055 = vmatpush3.bf16.msra.mxu1 %v1069_v0  ;;  %v1073_v5 = vld [vmem:[#allocation5 + $0x20] sm:$0xff]   ;;  %v1074_v6 = vld [vmem:[#allocation5 + $0x28] sm:$0xff]   ;;  %v1075_v7 = vld [vmem:[#allocation5 + $0x30] sm:$0xff]   ;;  %s1153_s13 = scalar_lea.vmem %s864_s10, 128  ;;  %p1158_p3 = scmp.lt.s32.totalorder %s864_s10, %s864_s10 }
  0x2a   :  { %969 = vmatprep.subr.bf16.mxu0 %v1070_v1  ;;  %1048 = vmatprep.subr.bf16.mxu1 %v1070_v1  ;;  %v1076_v8 = vld [vmem:[#allocation5 + $0x38] sm:$0xff]   ;;  %v1093_v9 = vld [vmem:[#allocation2 + $0x80] sm:$0xff]   ;;  %v1078_v10 = vld [vmem:[#allocation2 + $0x8] sm:$0xff]   ;;  %p1154_p2 = scmp.ne.s32.totalorder %s864_s10, %s1153_s13  ;;  %p1159_p4 = scmp.lt.s32.totalorder %s1153_s13, %s1153_s13 }
  0x2b   :  { %983 = vmatprep.mubr.bf16.mxu0 %v1077_v4  ;;  %1015 = vmatprep.mubr.bf16.mxu1 %v1093_v9  ;;  %v1079_v11 = vld [vmem:[#allocation2 + $0x10] sm:$0xff]   ;;  %v1094_v12 = vld [vmem:[#allocation2 + $0x88] sm:$0xff]   ;;  %v1080_v14 = vld [vmem:[#allocation2 + $0x18] sm:$0xff]  }
  0x2c   :  { %v1095_v13 = vld [vmem:[#allocation2 + $0x90] sm:$0xff]   ;;  %v1081_v15 = vld [vmem:[#allocation2 + $0x20] sm:$0xff]   ;;  %v1096_v16 = vld [vmem:[#allocation2 + $0x98] sm:$0xff]   ;;  %p1160_p5 = por %p1159_p4, %p1158_p3 }
  0x2d   :  { %970 = vmatpush3.bf16.msra.mxu0 %v1070_v1  ;;  %1056 = vmatpush3.bf16.msra.mxu1 %v1070_v1  ;;  %v1097_v17 = vld [vmem:[#allocation2 + $0xa0] sm:$0xff]   ;;  %v1082_v18 = vld [vmem:[#allocation2 + $0x28] sm:$0xff]   ;;  %v1083_v20 = vld [vmem:[#allocation2 + $0x30] sm:$0xff]  }
  0x2e   :  { %971 = vmatprep.subr.bf16.mxu0 %v1071_v2  ;;  %1049 = vmatprep.subr.bf16.mxu1 %v1071_v2  ;;  %v1098_v19 = vld [vmem:[#allocation2 + $0xa8] sm:$0xff]   ;;  %v1099_v21 = vld [vmem:[#allocation2 + $0xb0] sm:$0xff]   ;;  %v1084_v22 = vld [vmem:[#allocation2 + $0x38] sm:$0xff]   ;;  %p1161_p6 = pnand %p1160_p5, %p1154_p2 }
  0x2f   :  { %v1100_v23 = vld [vmem:[#allocation2 + $0xb8] sm:$0xff]   ;;  %v1085_v24 = vld [vmem:[#allocation2 + $0x40] sm:$0xff]   ;;  %v1086_v26 = vld [vmem:[#allocation2 + $0x48] sm:$0xff]  }
  0x30   :  { %v1101_v25 = vld [vmem:[#allocation2 + $0xc0] sm:$0xff]   ;;  %v1102_v27 = vld [vmem:[#allocation2 + $0xc8] sm:$0xff]   ;;  %v1087_v28 = vld [vmem:[#allocation2 + $0x50] sm:$0xff]  }
  0x31   :  { %972 = vmatpush3.bf16.msra.mxu0 %v1071_v2  ;;  %1057 = vmatpush3.bf16.msra.mxu1 %v1071_v2  ;;  %v1103_v29 = vld [vmem:[#allocation2 + $0xd0] sm:$0xff]   ;;  %v1088_v30 = vld [vmem:[#allocation2 + $0x58] sm:$0xff]   ;;  %v1089_v32 = vld [vmem:[#allocation2 + $0x60] sm:$0xff]  }
  0x32   :  { %973 = vmatprep.subr.bf16.mxu0 %v1072_v3  ;;  %1050 = vmatprep.subr.bf16.mxu1 %v1072_v3  ;;  %v1104_v31 = vld [vmem:[#allocation2 + $0xd8] sm:$0xff]   ;;  %v1105_v33 = vld [vmem:[#allocation2 + $0xe0] sm:$0xff]   ;;  %v1090_v34 = vld [vmem:[#allocation2 + $0x68] sm:$0xff]  }
  0x33   :  { %v1106_v35 = vld [vmem:[#allocation2 + $0xe8] sm:$0xff]   ;;  %v1091_v36 = vld [vmem:[#allocation2 + $0x70] sm:$0xff]   ;;  %v1092_v38 = vld [vmem:[#allocation2 + $0x78] sm:$0xff]  }
  0x34   :  { %v1107_v37 = vld [vmem:[#allocation2 + $0xf0] sm:$0xff]   ;;  %v1108_v39 = vld [vmem:[#allocation2 + $0xf8] sm:$0xff]  }
  0x35   :  { %974 = vmatpush3.bf16.msra.mxu0 %v1072_v3  ;;  %1058 = vmatpush3.bf16.msra.mxu1 %v1072_v3 }
  0x36   :  { %975 = vmatprep.subr.bf16.mxu0 %v1073_v5  ;;  %1051 = vmatprep.subr.bf16.mxu1 %v1073_v5 }
  0x39   :  { %976 = vmatpush3.bf16.msra.mxu0 %v1073_v5  ;;  %1059 = vmatpush3.bf16.msra.mxu1 %v1073_v5 }
  0x3a   :  { %977 = vmatprep.subr.bf16.mxu0 %v1074_v6  ;;  %1052 = vmatprep.subr.bf16.mxu1 %v1074_v6 }
  0x3d   :  { %978 = vmatpush3.bf16.msra.mxu0 %v1074_v6  ;;  %1060 = vmatpush3.bf16.msra.mxu1 %v1074_v6 }
  0x3e   :  { %979 = vmatprep.subr.bf16.mxu0 %v1075_v7  ;;  %1053 = vmatprep.subr.bf16.mxu1 %v1075_v7 }
  0x41   :  { %980 = vmatpush3.bf16.msra.mxu0 %v1075_v7  ;;  %1061 = vmatpush3.bf16.msra.mxu1 %v1075_v7 }
  0x42   :  { %981 = vmatprep.subr.bf16.mxu0 %v1076_v8  ;;  %1054 = vmatprep.subr.bf16.mxu1 %v1076_v8 }
  0x45   :  { %982 = vmatpush3.bf16.msra.mxu0 %v1076_v8  ;;  %1062 = vmatpush3.bf16.msra.mxu1 %v1076_v8 }
  0x48   :  { %984 = vmatmul.mubr.bf16.vlgmr.msra.gmra.mrb[0].mxu0 %v1078_v10  ;;  %1016 = vmatmul.mubr.bf16.vlgmr.msra.gmra.mrb[0].mxu1 %v1094_v12 }
  0x49   :  { %987 = vmatprep.mubr.bf16.mxu0 %v1079_v11  ;;  %1019 = vmatprep.mubr.bf16.mxu1 %v1095_v13 }
  0x50   :  { %988 = vmatmul.mubr.bf16.gmra.mrb[4].mxu0 %v1080_v14  ;;  %1020 = vmatmul.mubr.bf16.gmra.mrb[4].mxu1 %v1096_v16 }
  0x51   :  { %991 = vmatprep.mubr.bf16.mxu0 %v1081_v15  ;;  %1023 = vmatprep.mubr.bf16.mxu1 %v1097_v17 }
  0x58   :  { %992 = vmatmul.mubr.bf16.gmra.mrb[8].mxu0 %v1082_v18  ;;  %1024 = vmatmul.mubr.bf16.gmra.mrb[8].mxu1 %v1098_v19 }
  0x59   :  { %995 = vmatprep.mubr.bf16.mxu0 %v1083_v20  ;;  %1027 = vmatprep.mubr.bf16.mxu1 %v1099_v21 }
  0x60   :  { %996 = vmatmul.mubr.bf16.gmra.mrb[12].mxu0 %v1084_v22  ;;  %1028 = vmatmul.mubr.bf16.gmra.mrb[12].mxu1 %v1100_v23 }
  0x61   :  { %999 = vmatprep.mubr.bf16.mxu0 %v1085_v24  ;;  %1031 = vmatprep.mubr.bf16.mxu1 %v1101_v25 }
  0x68   :  { %1000 = vmatmul.mubr.bf16.gmra.mrb[16].mxu0 %v1086_v26  ;;  %1032 = vmatmul.mubr.bf16.gmra.mrb[16].mxu1 %v1102_v27 }
  0x69   :  { %1003 = vmatprep.mubr.bf16.mxu0 %v1087_v28  ;;  %1035 = vmatprep.mubr.bf16.mxu1 %v1103_v29 }
  0x70   :  { %1004 = vmatmul.mubr.bf16.gmra.mrb[20].mxu0 %v1088_v30  ;;  %1036 = vmatmul.mubr.bf16.gmra.mrb[20].mxu1 %v1104_v31 }
  0x71   :  { %1007 = vmatprep.mubr.bf16.mxu0 %v1089_v32  ;;  %1039 = vmatprep.mubr.bf16.mxu1 %v1105_v33 }
  0x78   :  { %1008 = vmatmul.mubr.bf16.gmra.mrb[24].mxu0 %v1090_v34  ;;  %1040 = vmatmul.mubr.bf16.gmra.mrb[24].mxu1 %v1106_v35 }
  0x79   :  { %1011 = vmatprep.mubr.bf16.mxu0 %v1091_v36  ;;  %1043 = vmatprep.mubr.bf16.mxu1 %v1107_v37 }
  0x80   :  { %1012 = vmatmul.mubr.bf16.gmra.mrb[28].mxu0 %v1092_v38  ;;  %1044 = vmatmul.mubr.bf16.gmra.mrb[28].mxu1 %v1108_v39 }
 0x11b   :  { %v985_v40 = vpop.f32.mrb[0].mxu0  ;;  %v1255_v41 = vpop.f32.mrb[0].mxu1 }
 0x11c   :  { %v398_v42 = vpop.f32.mrb[1].mxu0  ;;  %v1257_v43 = vpop.f32.mrb[1].mxu1  ;;  %v724_v51 = vmul.f32 %v985_v40, %v985_v40 }
 0x11d   :  { %v986_v44 = vpop.f32.mrb[2].mxu0  ;;  %v1259_v45 = vpop.f32.mrb[2].mxu1  ;;  %v722_v48 = vmul.f32 %v398_v42, %v398_v42 }
 0x11e   :  { %v401_v46 = vpop.f32.mrb[3].mxu0  ;;  %v1261_v47 = vpop.f32.mrb[3].mxu1  ;;  %v725_v54 = vmul.f32 %v986_v44, %v986_v44 }
 0x11f   :  { %v653_v49 = vadd.f32 %v401_v46, %v398_v42  ;;  %v723_v50 = vmul.f32 %v401_v46, %v401_v46 }
 0x121   :  { %v654_v52 = vadd.f32 %v985_v40, %v653_v49  ;;  %v786_v53 = vadd.f32 %v723_v50, %v722_v48 }
 0x123   :  { %v787_v55 = vadd.f32 %v786_v53, %v724_v51  ;;  %v989_v56 = vpop.f32.mrb[4].mxu0  ;;  %v655_v57 = vadd.f32 %v986_v44, %v654_v52  ;;  %v1263_v58 = vpop.f32.mrb[4].mxu1 }
 0x124   :  { %v414_v59 = vpop.f32.mrb[5].mxu0  ;;  %v1265_v60 = vpop.f32.mrb[5].mxu1  ;;  %v728_v7 = vmul.f32 %v989_v56, %v989_v56 }
 0x125   :  { %v656_v61 = vadd.f32 %v655_v57, %v414_v59  ;;  %v726_v62 = vmul.f32 %v414_v59, %v414_v59  ;;  %v788_v63 = vadd.f32 %v787_v55, %v725_v54  ;;  %v990_v0 = vpop.f32.mrb[6].mxu0  ;;  %v1267_v1 = vpop.f32.mrb[6].mxu1 }
 0x126   :  { %v417_v2 = vpop.f32.mrb[7].mxu0  ;;  %v1269_v3 = vpop.f32.mrb[7].mxu1  ;;  %v729_v10 = vmul.f32 %v990_v0, %v990_v0 }
 0x127   :  { %v789_v4 = vadd.f32 %v788_v63, %v726_v62  ;;  %v657_v5 = vadd.f32 %v656_v61, %v417_v2  ;;  %v727_v6 = vmul.f32 %v417_v2, %v417_v2 }
 0x129   :  { %v658_v8 = vadd.f32 %v989_v56, %v657_v5  ;;  %v790_v9 = vadd.f32 %v789_v4, %v727_v6 }
 0x12b   :  { %v791_v11 = vadd.f32 %v790_v9, %v728_v7  ;;  %v993_v12 = vpop.f32.mrb[8].mxu0  ;;  %v659_v13 = vadd.f32 %v990_v0, %v658_v8  ;;  %v1271_v14 = vpop.f32.mrb[8].mxu1 }
 0x12c   :  { %v430_v15 = vpop.f32.mrb[9].mxu0  ;;  %v1273_v16 = vpop.f32.mrb[9].mxu1  ;;  %v732_v27 = vmul.f32 %v993_v12, %v993_v12 }
 0x12d   :  { %v660_v17 = vadd.f32 %v659_v13, %v430_v15  ;;  %v730_v18 = vmul.f32 %v430_v15, %v430_v15  ;;  %v792_v19 = vadd.f32 %v791_v11, %v729_v10  ;;  %v994_v20 = vpop.f32.mrb[10].mxu0  ;;  %v1275_v21 = vpop.f32.mrb[10].mxu1 }
 0x12e   :  { %v433_v22 = vpop.f32.mrb[11].mxu0  ;;  %v1277_v23 = vpop.f32.mrb[11].mxu1  ;;  %v733_v30 = vmul.f32 %v994_v20, %v994_v20 }
 0x12f   :  { %v793_v24 = vadd.f32 %v792_v19, %v730_v18  ;;  %v661_v25 = vadd.f32 %v660_v17, %v433_v22  ;;  %v731_v26 = vmul.f32 %v433_v22, %v433_v22 }
 0x131   :  { %v662_v28 = vadd.f32 %v993_v12, %v661_v25  ;;  %v794_v29 = vadd.f32 %v793_v24, %v731_v26 }
 0x133   :  { %v795_v31 = vadd.f32 %v794_v29, %v732_v27  ;;  %v997_v32 = vpop.f32.mrb[12].mxu0  ;;  %v663_v33 = vadd.f32 %v994_v20, %v662_v28  ;;  %v1279_v34 = vpop.f32.mrb[12].mxu1 }
 0x134   :  { %v446_v35 = vpop.f32.mrb[13].mxu0  ;;  %v1281_v36 = vpop.f32.mrb[13].mxu1  ;;  %v736_v51 = vmul.f32 %v997_v32, %v997_v32 }
 0x135   :  { %v664_v37 = vadd.f32 %v663_v33, %v446_v35  ;;  %v734_v38 = vmul.f32 %v446_v35, %v446_v35  ;;  %v796_v39 = vadd.f32 %v795_v31, %v733_v30  ;;  %v998_v40 = vpop.f32.mrb[14].mxu0  ;;  %v1283_v42 = vpop.f32.mrb[14].mxu1 }
 0x136   :  { %v449_v44 = vpop.f32.mrb[15].mxu0  ;;  %v1285_v46 = vpop.f32.mrb[15].mxu1  ;;  %v737_v54 = vmul.f32 %v998_v40, %v998_v40 }
 0x137   :  { %v797_v48 = vadd.f32 %v796_v39, %v734_v38  ;;  %v665_v49 = vadd.f32 %v664_v37, %v449_v44  ;;  %v735_v50 = vmul.f32 %v449_v44, %v449_v44 }
 0x139   :  { %v666_v52 = vadd.f32 %v997_v32, %v665_v49  ;;  %v798_v53 = vadd.f32 %v797_v48, %v735_v50 }
 0x13b   :  { %v799_v55 = vadd.f32 %v798_v53, %v736_v51  ;;  %v1001_v56 = vpop.f32.mrb[16].mxu0  ;;  %v667_v57 = vadd.f32 %v998_v40, %v666_v52  ;;  %v1287_v59 = vpop.f32.mrb[16].mxu1 }
 0x13c   :  { %v462_v61 = vpop.f32.mrb[17].mxu0  ;;  %v1289_v62 = vpop.f32.mrb[17].mxu1  ;;  %v740_v11 = vmul.f32 %v1001_v56, %v1001_v56 }
 0x13d   :  { %v668_v63 = vadd.f32 %v667_v57, %v462_v61  ;;  %v738_v0 = vmul.f32 %v462_v61, %v462_v61  ;;  %v800_v2 = vadd.f32 %v799_v55, %v737_v54  ;;  %v1002_v4 = vpop.f32.mrb[18].mxu0  ;;  %v1291_v5 = vpop.f32.mrb[18].mxu1 }
 0x13e   :  { %v465_v6 = vpop.f32.mrb[19].mxu0  ;;  %v1293_v7 = vpop.f32.mrb[19].mxu1  ;;  %v741_v15 = vmul.f32 %v1002_v4, %v1002_v4 }
 0x13f   :  { %v801_v8 = vadd.f32 %v800_v2, %v738_v0  ;;  %v669_v9 = vadd.f32 %v668_v63, %v465_v6  ;;  %v739_v10 = vmul.f32 %v465_v6, %v465_v6 }
 0x141   :  { %v670_v12 = vadd.f32 %v1001_v56, %v669_v9  ;;  %v802_v13 = vadd.f32 %v801_v8, %v739_v10 }
 0x143   :  { %v803_v17 = vadd.f32 %v802_v13, %v740_v11  ;;  %v1005_v18 = vpop.f32.mrb[20].mxu0  ;;  %v671_v19 = vadd.f32 %v1002_v4, %v670_v12  ;;  %v1295_v20 = vpop.f32.mrb[20].mxu1 }
 0x144   :  { %v478_v22 = vpop.f32.mrb[21].mxu0  ;;  %v1297_v24 = vpop.f32.mrb[21].mxu1  ;;  %v744_v37 = vmul.f32 %v1005_v18, %v1005_v18 }
 0x145   :  { %v672_v25 = vadd.f32 %v671_v19, %v478_v22  ;;  %v742_v26 = vmul.f32 %v478_v22, %v478_v22  ;;  %v804_v27 = vadd.f32 %v803_v17, %v741_v15  ;;  %v1006_v28 = vpop.f32.mrb[22].mxu0  ;;  %v1299_v29 = vpop.f32.mrb[22].mxu1 }
 0x146   :  { %v481_v30 = vpop.f32.mrb[23].mxu0  ;;  %v1301_v31 = vpop.f32.mrb[23].mxu1  ;;  %v745_v40 = vmul.f32 %v1006_v28, %v1006_v28 }
 0x147   :  { %v805_v32 = vadd.f32 %v804_v27, %v742_v26  ;;  %v673_v33 = vadd.f32 %v672_v25, %v481_v30  ;;  %v743_v35 = vmul.f32 %v481_v30, %v481_v30 }
 0x149   :  { %v674_v38 = vadd.f32 %v1005_v18, %v673_v33  ;;  %v806_v39 = vadd.f32 %v805_v32, %v743_v35 }
 0x14b   :  { %v807_v44 = vadd.f32 %v806_v39, %v744_v37  ;;  %v1009_v48 = vpop.f32.mrb[24].mxu0  ;;  %v675_v49 = vadd.f32 %v1006_v28, %v674_v38  ;;  %v1303_v50 = vpop.f32.mrb[24].mxu1 }
 0x14c   :  { %v494_v51 = vpop.f32.mrb[25].mxu0  ;;  %v1305_v52 = vpop.f32.mrb[25].mxu1  ;;  %v748_v6 = vmul.f32 %v1009_v48, %v1009_v48 }
 0x14d   :  { %v676_v53 = vadd.f32 %v675_v49, %v494_v51  ;;  %v746_v54 = vmul.f32 %v494_v51, %v494_v51  ;;  %v808_v55 = vadd.f32 %v807_v44, %v745_v40  ;;  %v1010_v56 = vpop.f32.mrb[26].mxu0  ;;  %v1307_v57 = vpop.f32.mrb[26].mxu1  ;;  %v754_v49 = vmul.f32 %v1257_v43, %v1257_v43 }
 0x14e   :  { %v497_v61 = vpop.f32.mrb[27].mxu0  ;;  %v1309_v63 = vpop.f32.mrb[27].mxu1  ;;  %v749_v10 = vmul.f32 %v1010_v56, %v1010_v56 }
 0x14f   :  { %v809_v0 = vadd.f32 %v808_v55, %v746_v54  ;;  %v677_v2 = vadd.f32 %v676_v53, %v497_v61  ;;  %v747_v4 = vmul.f32 %v497_v61, %v497_v61  ;;  %v756_v61 = vmul.f32 %v1255_v41, %v1255_v41 }
 0x151   :  { %v678_v8 = vadd.f32 %v1009_v48, %v677_v2  ;;  %v810_v9 = vadd.f32 %v809_v0, %v747_v4  ;;  %v757_v4 = vmul.f32 %v1259_v45, %v1259_v45 }
 0x153   :  { %v811_v11 = vadd.f32 %v810_v9, %v748_v6  ;;  %v1013_v12 = vpop.f32.mrb[28].mxu0  ;;  %v679_v13 = vadd.f32 %v1010_v56, %v678_v8  ;;  %v1311_v15 = vpop.f32.mrb[28].mxu1  ;;  %v755_v56 = vmul.f32 %v1261_v47, %v1261_v47 }
 0x154   :  { %v510_v17 = vpop.f32.mrb[29].mxu0  ;;  %v1313_v18 = vpop.f32.mrb[29].mxu1  ;;  %v752_v37 = vmul.f32 %v1013_v12, %v1013_v12 }
 0x155   :  { %v680_v19 = vadd.f32 %v679_v13, %v510_v17  ;;  %v750_v22 = vmul.f32 %v510_v17, %v510_v17  ;;  %v812_v25 = vadd.f32 %v811_v11, %v749_v10  ;;  %v1014_v26 = vpop.f32.mrb[30].mxu0  ;;  %v1315_v27 = vpop.f32.mrb[30].mxu1 }
 0x156   :  { %v513_v28 = vpop.f32.mrb[31].mxu0  ;;  %v1317_v30 = vpop.f32.mrb[31].mxu1  ;;  %v753_v40 = vmul.f32 %v1014_v26, %v1014_v26 }
 0x157   :  { %v813_v32 = vadd.f32 %v812_v25, %v750_v22  ;;  %v681_v33 = vadd.f32 %v680_v19, %v513_v28  ;;  %v751_v35 = vmul.f32 %v513_v28, %v513_v28 }
 0x159   :  { %v682_v38 = vadd.f32 %v1013_v12, %v681_v33  ;;  %v814_v39 = vadd.f32 %v813_v32, %v751_v35  ;;  %v759_v12 = vmul.f32 %v1269_v3, %v1269_v3  ;;  %v763_v32 = vmul.f32 %v1277_v23, %v1277_v23 }
 0x15b   :  { %v815_v44 = vadd.f32 %v814_v39, %v752_v37  ;;  %v683_v48 = vadd.f32 %v1014_v26, %v682_v38 }
 0x15d   :  { %v684_v51 = vadd.f32 %v683_v48, %v1257_v43  ;;  %v816_v53 = vadd.f32 %v815_v44, %v753_v40  ;;  %v758_v43 = vmul.f32 %v1265_v60, %v1265_v60  ;;  %v767_v48 = vmul.f32 %v1285_v46, %v1285_v46 }
 0x15f   :  { %v817_v54 = vadd.f32 %v816_v53, %v754_v49  ;;  %v685_v55 = vadd.f32 %v684_v51, %v1261_v47 }
 0x161   :  { %v686_v0 = vadd.f32 %v1255_v41, %v685_v55  ;;  %v818_v2 = vadd.f32 %v817_v54, %v755_v56  ;;  %v760_v41 = vmul.f32 %v1263_v58, %v1263_v58 }
 0x163   :  { %v819_v6 = vadd.f32 %v818_v2, %v756_v61  ;;  %v687_v8 = vadd.f32 %v1259_v45, %v686_v0  ;;  %v761_v45 = vmul.f32 %v1267_v1, %v1267_v1  ;;  %v771_v0 = vmul.f32 %v1293_v7, %v1293_v7 }
 0x165   :  { %v688_v9 = vadd.f32 %v687_v8, %v1265_v60  ;;  %v820_v10 = vadd.f32 %v819_v6, %v757_v4  ;;  %v762_v60 = vmul.f32 %v1273_v16, %v1273_v16 }
 0x167   :  { %v821_v11 = vadd.f32 %v820_v10, %v758_v43  ;;  %v689_v47 = vadd.f32 %v688_v9, %v1269_v3 }
 0x169   :  { %v690_v13 = vadd.f32 %v1263_v58, %v689_v47  ;;  %v822_v17 = vadd.f32 %v821_v11, %v759_v12  ;;  %v764_v58 = vmul.f32 %v1271_v14, %v1271_v14  ;;  %v775_v11 = vmul.f32 %v1301_v31, %v1301_v31 }
 0x16b   :  { %v823_v19 = vadd.f32 %v822_v17, %v760_v41  ;;  %v691_v22 = vadd.f32 %v1267_v1, %v690_v13  ;;  %v765_v1 = vmul.f32 %v1275_v21, %v1275_v21 }
 0x16d   :  { %v692_v25 = vadd.f32 %v691_v22, %v1273_v16  ;;  %v824_v26 = vadd.f32 %v823_v19, %v761_v45  ;;  %v766_v16 = vmul.f32 %v1281_v36, %v1281_v36  ;;  %v779_v22 = vmul.f32 %v1309_v63, %v1309_v63 }
 0x16f   :  { %v825_v28 = vadd.f32 %v824_v26, %v762_v60  ;;  %v693_v3 = vadd.f32 %v692_v25, %v1277_v23 }
 0x171   :  { %v694_v33 = vadd.f32 %v1271_v14, %v693_v3  ;;  %v826_v35 = vadd.f32 %v825_v28, %v763_v32  ;;  %v768_v14 = vmul.f32 %v1279_v34, %v1279_v34 }
 0x173   :  { %v827_v37 = vadd.f32 %v826_v35, %v764_v58  ;;  %v695_v38 = vadd.f32 %v1275_v21, %v694_v33  ;;  %v769_v21 = vmul.f32 %v1283_v42, %v1283_v42  ;;  %v783_v33 = vmul.f32 %v1317_v30, %v1317_v30 }
 0x175   :  { %v696_v39 = vadd.f32 %v695_v38, %v1281_v36  ;;  %v828_v40 = vadd.f32 %v827_v37, %v765_v1  ;;  %v770_v36 = vmul.f32 %v1289_v62, %v1289_v62 }
 0x177   :  { %v829_v44 = vadd.f32 %v828_v40, %v766_v16  ;;  %v697_v23 = vadd.f32 %v696_v39, %v1285_v46 }
 0x179   :  { %v698_v49 = vadd.f32 %v1279_v34, %v697_v23  ;;  %v830_v51 = vadd.f32 %v829_v44, %v767_v48  ;;  %v772_v34 = vmul.f32 %v1287_v59, %v1287_v59 }
 0x17b   :  { %v831_v53 = vadd.f32 %v830_v51, %v768_v14  ;;  %v699_v54 = vadd.f32 %v1283_v42, %v698_v49  ;;  %v773_v42 = vmul.f32 %v1291_v5, %v1291_v5 }
 0x17d   :  { %v700_v55 = vadd.f32 %v699_v54, %v1289_v62  ;;  %v832_v56 = vadd.f32 %v831_v53, %v769_v21  ;;  %v774_v62 = vmul.f32 %v1297_v24, %v1297_v24 }
 0x17f   :  { %v833_v61 = vadd.f32 %v832_v56, %v770_v36  ;;  %v701_v46 = vadd.f32 %v700_v55, %v1293_v7 }
 0x181   :  { %v702_v2 = vadd.f32 %v1287_v59, %v701_v46  ;;  %v834_v4 = vadd.f32 %v833_v61, %v771_v0  ;;  %v776_v59 = vmul.f32 %v1295_v20, %v1295_v20 }
 0x183   :  { %v835_v6 = vadd.f32 %v834_v4, %v772_v34  ;;  %v703_v8 = vadd.f32 %v1291_v5, %v702_v2  ;;  %v777_v5 = vmul.f32 %v1299_v29, %v1299_v29 }
 0x185   :  { %v704_v43 = vadd.f32 %v703_v8, %v1297_v24  ;;  %v836_v9 = vadd.f32 %v835_v6, %v773_v42  ;;  %v778_v24 = vmul.f32 %v1305_v52, %v1305_v52 }
 0x187   :  { %v837_v10 = vadd.f32 %v836_v9, %v774_v62  ;;  %v705_v7 = vadd.f32 %v704_v43, %v1301_v31 }
 0x189   :  { %v706_v47 = vadd.f32 %v1295_v20, %v705_v7  ;;  %v838_v12 = vadd.f32 %v837_v10, %v775_v11  ;;  %v780_v20 = vmul.f32 %v1303_v50, %v1303_v50 }
 0x18b   :  { %v839_v41 = vadd.f32 %v838_v12, %v776_v59  ;;  %v707_v13 = vadd.f32 %v1299_v29, %v706_v47  ;;  %v781_v29 = vmul.f32 %v1307_v57, %v1307_v57 }
 0x18d   :  { %v708_v17 = vadd.f32 %v707_v13, %v1305_v52  ;;  %v840_v45 = vadd.f32 %v839_v41, %v777_v5  ;;  %v782_v52 = vmul.f32 %v1313_v18, %v1313_v18 }
 0x18f   :  { %v841_v19 = vadd.f32 %v840_v45, %v778_v24  ;;  %v709_v31 = vadd.f32 %v708_v17, %v1309_v63 }
 0x191   :  { %v710_v60 = vadd.f32 %v1303_v50, %v709_v31  ;;  %v842_v25 = vadd.f32 %v841_v19, %v779_v22  ;;  %v784_v50 = vmul.f32 %v1311_v15, %v1311_v15 }
 0x193   :  { %v843_v26 = vadd.f32 %v842_v25, %v780_v20  ;;  %v711_v28 = vadd.f32 %v1307_v57, %v710_v60  ;;  %v785_v57 = vmul.f32 %v1315_v27, %v1315_v27 }
 0x195   :  { %v712_v3 = vadd.f32 %v711_v28, %v1313_v18  ;;  %v844_v32 = vadd.f32 %v843_v26, %v781_v29 }
 0x197   :  { %v845_v58 = vadd.f32 %v844_v32, %v782_v52  ;;  %v713_v63 = vadd.f32 %v712_v3, %v1317_v30 }
 0x199   :  { %v714_v35 = vadd.f32 %v1311_v15, %v713_v63  ;;  %v846_v1 = vadd.f32 %v845_v58, %v783_v33 }
 0x19b   :  { %v715_v37 = vadd.f32 %v1315_v27, %v714_v35  ;;  %v847_v38 = vadd.f32 %v846_v1, %v784_v50 }
 0x19d   :  { %v716_v18 = vrot.slane %v715_v37, 4  ;;  %v848_v16 = vadd.f32 %v847_v38, %v785_v57 }
 0x19f   :  { %v717_v39 = vadd.f32 %v716_v18, %v715_v37  ;;  %v849_v40 = vrot.slane %v848_v16, 4 }
 0x1a1   :  { %v718_v44 = vrot.slane %v717_v39, 2  ;;  %v850_v23 = vadd.f32 %v849_v40, %v848_v16 }
 0x1a3   :  { %v719_v48 = vadd.f32 %v718_v44, %v717_v39  ;;  %v851_v30 = vrot.slane %v850_v23, 2 }
 0x1a5   :  { %v720_v14 = vrot.slane %v719_v48, 1  ;;  %v852_v49 = vadd.f32 %v851_v30, %v850_v23 }
 0x1a7   :  { %v721_v15 = vadd.f32 %v720_v14, %v719_v48  ;;  %v853_v51 = vrot.slane %v852_v49, 1 }
 0x1a9   :  { %855 = vst [vmem:[#allocation7] sm:$0xff] %v721_v15  ;;  %v854_v27 = vadd.f32 %v853_v51, %v852_v49 }
 0x1aa   :  { %1164 = shalt.err (!%p1161_p6)
}
 0x1ab   :  { %s1165_s16 = scalar_lea.hbm %s1441_s2, 128 }
 0x1ac   :  { %p1166_p7 = scmp.ne.s32.totalorder %s1441_s2, %s1165_s16  ;;  %p1169_p8 = scmp.lt.u32.totalorder %s1165_s16, %s1441_s2 }
 0x1ae   :  { %p1171_p9 = pnand %p1169_p8, %p1166_p7 }
 0x1b0   :  { %1174 = shalt.err (!%p1171_p9)
}
 0x1b1   :  { %866 = dma.vmem_to_hbm [thread:$0]  %s864_s10, 128, %s1441_s2, [#allocation4]   ;;  %856 = vst [vmem:[#allocation8] sm:$0xff] %v854_v27 }
 0x1b2   :  { %s1175_s23 = scalar_lea.vmem %s874_s12, 128  ;;  %p1180_p11 = scmp.lt.s32.totalorder %s874_s12, %s874_s12 }
 0x1b3   :  { %p1176_p10 = scmp.ne.s32.totalorder %s874_s12, %s1175_s23  ;;  %p1181_p12 = scmp.lt.s32.totalorder %s1175_s23, %s1175_s23 }
 0x1b5   :  { %p1182_p13 = por %p1181_p12, %p1180_p11 }
 0x1b7   :  { %p1183_p0 = pnand %p1182_p13, %p1176_p10 }
 0x1b9   :  { %1186 = shalt.err (!%p1183_p0)
}
 0x1ba   :  { %s1187_s26 = scalar_lea.hbm %s1442_s3, 128 }
 0x1bb   :  { %p1188_p1 = scmp.ne.s32.totalorder %s1442_s3, %s1187_s26  ;;  %p1191_p2 = scmp.lt.u32.totalorder %s1187_s26, %s1442_s3 }
 0x1bd   :  { %p1193_p3 = pnand %p1191_p2, %p1188_p1 }
 0x1bf   :  { %1196 = shalt.err (!%p1193_p3)
}
 0x1c0   :  { %876 = dma.vmem_to_hbm [thread:$0]  %s874_s12, 128, %s1442_s3, [#allocation9]  }
 0x1c1   :  { %1201 = dma.done.wait [#allocation4], 128  }
 0x1c2   :  { %1202 = vsyncadd [#allocation4], 4294967168 }
 0x1c3   :  { %1203 = dma.done.wait [#allocation9], 128  }
 0x1c4   :  { %1204 = vsyncadd [#allocation9], 4294967168 }
 0x1c5   :  { %883 = vsyncpa [#allocation3], 1 }
 0x1c6   :  { %884 = vsyncpa [#allocation6], 1 }
 0x1c7   :  { %885 = vsyncpa [#allocation4], 1 }
 0x1c8   :  { %886 = vsyncpa [#allocation9], 1 }

</bundles_post_ra>
